<compile_context>
chip_gen: v7x
topology: tpu7x:2x2x1
jax: 0.10.0
libtpu: 0.0.40
codegen_flags: <defaults>
</compile_context>

<pallas_src>
import math

import jax
import jax.numpy as jnp
from jax.experimental import pallas as pl
from jax.experimental.pallas import tpu as pltpu


def _spe_patchfy_kernel(x_ref, w_ref, pos_ref, o_ref):
    # x_ref:   (TM, r*F)   TM packed token rows per grid step
    # w_ref:   (r*F, r*D)  block-diagonal fused proj->Espe weight
    # pos_ref: (TM, r*D)   positional embedding (+ fused biases) tiled to TM rows
    # o_ref:   (TM, r*D)
    y = jnp.dot(x_ref[...], w_ref[...], preferred_element_type=jnp.float32)
    o_ref[...] = (y + pos_ref[...]).astype(o_ref.dtype)


def _divisors(n):
    ds = set()
    i = 1
    while i * i <= n:
        if n % i == 0:
            ds.add(i)
            ds.add(n // i)
        i += 1
    return sorted(ds)


def spe_patchfy_forward(x, params, *, spe_size, patch_size, center_size=3,
                        compute_dtype=None, out_dtype=None,
                        min_grid_steps=1, vmem_budget_bytes=10 * 2**20,
                        vmem_limit_bytes=None):
    """x: (B, C, P, P). Returns (B, C // spe_size, D_model)."""
    B, C, P, P2 = x.shape
    assert P == patch_size and P2 == patch_size, "spatial size must equal patch_size"
    assert C % spe_size == 0, "channel must be divisible by spe_size"

    spamap = center_size * center_size            # 9
    F = spamap * spe_size                         # per-token fused input features
    L = C // spe_size                             # sequence length
    D = params["w2"].shape[0]                     # D_model

    # center crop indices: identical to the PyTorch module (off-center on even P,
    # exactly as in the reference implementation).
    start = patch_size // 2 - 1
    end = start + center_size
    assert 0 <= start and end <= patch_size

    out_dtype = jnp.dtype(out_dtype) if out_dtype is not None else jnp.dtype(x.dtype)
    in_dtype = jnp.dtype(compute_dtype) if compute_dtype is not None else jnp.dtype(x.dtype)

    # ---- lane-dense repack: r tokens per row so the output row is r*D lanes ----
    if D < 128 and 128 % D == 0:
        r = math.gcd(L, 128 // D)
    else:
        r = 1                                      # D already lane-dense; do NOT pad D
    Lp = L // r                                    # packed positional period
    Mp = (B * L) // r                              # packed row count
    rF, rD = r * F, r * D

    # ---- activation glue: crop (strided slice) + free row-major reshape -------
    # xw[m', j*F + k*9 + i] = x_crop[b, l*spe + k, i] for token m'*r + j = b*L + l.
    xw = x[:, :, start:end, start:end].reshape(Mp, rF)
    if in_dtype != jnp.dtype(x.dtype):
        xw = xw.astype(in_dtype)

    # ---- parameter fusion (tiny, one-time XLA; HIGHEST precision) -------------
    hi = jax.lax.Precision.HIGHEST
    w1 = params["w1"]                              # (Dyipie, 9, spe) Conv1d weight
    w2 = params["w2"][:, :, 0]                     # (D, Dyipie) 1x1 Conv1d weight
    wf = jnp.einsum("oik,do->kid", w1, w2, precision=hi).reshape(F, D)
    bf = jnp.einsum("do,o->d", w2, params["b1"], precision=hi) + params["b2"]
    pos2 = (params["pos"] + bf[None, :]).astype(jnp.float32)        # (L, D)
    wf_p = jnp.kron(jnp.eye(r, dtype=wf.dtype), wf).astype(in_dtype)  # (rF, rD) block-diag
    pos_p = pos2.reshape(Lp, rD)                                    # (Lp, rD), f32

    # ---- row tiling: TM divides Mp exactly (no padded HBM copy) ---------------
    in_item = jnp.dtype(in_dtype).itemsize
    out_item = jnp.dtype(out_dtype).itemsize
    sub = 8 if in_item >= 4 else (16 if in_item == 2 else 32)       # sublane pack
    unit = (Lp * sub) // math.gcd(Lp, sub)                          # lcm(Lp, sub)

    def vmem_bytes(tm):
        lane = lambda n: -(-n // 128) * 128
        return (2 * tm * lane(rF) * in_item          # x blocks (double-buffered)
                + 2 * max(rF, 8) * lane(rD) * in_item  # weight
                + 2 * tm * lane(rD) * 4                # pos (f32)
                + 2 * tm * lane(rD) * out_item)        # out blocks

    if Mp % unit != 0:
        TM = Mp                       # single full-array block (always legal)
    else:
        n_units = Mp // unit
        TM = unit                     # fallback: smallest legal tile
        for g in _divisors(n_units):  # increasing -> fewest grid steps first
            tm = Mp // g
            if g >= min_grid_steps and vmem_bytes(tm) <= vmem_budget_bytes:
                TM = tm
                break
    grid = Mp // TM

    # positional rows repeat with period Lp; TM % Lp == 0 and every block starts
    # at a multiple of TM (hence of Lp), so one tiled copy serves every block.
    pos_tiled = jnp.tile(pos_p, (TM // Lp, 1))       # (TM, rD), stays f32

    out_flat = pl.pallas_call(
        _spe_patchfy_kernel,
        out_shape=jax.ShapeDtypeStruct((Mp, rD), out_dtype),
        grid_spec=pltpu.PrefetchScalarGridSpec(
            num_scalar_prefetch=0,
            grid=(grid,),
            in_specs=[
                pl.BlockSpec((TM, rF), lambda i: (i, 0)),
                pl.BlockSpec((rF, rD), lambda i: (0, 0)),
                pl.BlockSpec((TM, rD), lambda i: (0, 0)),
            ],
            out_specs=pl.BlockSpec((TM, rD), lambda i: (i, 0)),
        ),
        compiler_params=pltpu.CompilerParams(
            dimension_semantics=("parallel",),
            # fuse the crop/reshape/cast producer of xw into the pallas call
            allow_input_fusion=[True, False, False],
            vmem_limit_bytes=vmem_limit_bytes,
        ),
    )(xw, wf_p, pos_tiled)

    # free row-major view back to (B, L, D): token j of each packed row occupies
    # a contiguous D-wide slice, so the reshape is exact.
    return out_flat.reshape(B, L, D)


def _reference(x, params, *, spe_size, patch_size, center_size=3):
    """Pure-JAX reference mirroring the PyTorch forward (for validation)."""
    B, C, P, _ = x.shape
    spamap = center_size * center_size
    L = C // spe_size
    start = patch_size // 2 - 1
    end = start + center_size
    hi = jax.lax.Precision.HIGHEST
    xc = x[:, :, start:end, start:end].reshape(B, C, spamap)
    xc = jnp.transpose(xc, (0, 2, 1))                       # (B, 9, C)
    # Conv1d proj: stride == kernel == spe_size
    xw = xc.reshape(B, spamap, L, spe_size)
    h = jnp.einsum("bilk,oik->bol", xw, params["w1"], precision=hi) \
        + params["b1"][None, :, None]
    y = jnp.einsum("bol,do->bdl", h, params["w2"][:, :, 0], precision=hi) \
        + params["b2"][None, :, None]
    y = jnp.transpose(y, (0, 2, 1)) + params["pos"][None]
    return y


def make_params(key, *, spe_size, channel, D_model, center_size=3):
    spamap = center_size * center_size
    Dyipie = spamap * spe_size
    L = channel // spe_size
    k1, k2, k3, k4, k5 = jax.random.split(key, 5)
    # Deterministic synthetic init (shapes match nn.Conv1d / Parameter shapes).
    return {
        "w1": jax.random.normal(k1, (Dyipie, spamap, spe_size), jnp.float32) * 0.1,
        "b1": jax.random.normal(k2, (Dyipie,), jnp.float32) * 0.1,
        "w2": jax.random.normal(k3, (D_model, Dyipie, 1), jnp.float32) * 0.1,
        "b2": jax.random.normal(k4, (D_model,), jnp.float32) * 0.1,
        "pos": jax.random.normal(k5, (L, D_model), jnp.float32) * 0.01,
    }


if __name__ == "__main__":
    key = jax.random.PRNGKey(0)

    def run_case(idx, *, B, channel, spe_size, patch_size, D_model,
                 compute_dtype=None, min_grid_steps=1, atol=5e-3, rtol=5e-3):
        k = jax.random.fold_in(key, idx)
        kx, kp = jax.random.split(k)
        x = jax.random.normal(kx, (B, channel, patch_size, patch_size), jnp.float32)
        params = make_params(kp, spe_size=spe_size, channel=channel, D_model=D_model)
        out = spe_patchfy_forward(x, params, spe_size=spe_size, patch_size=patch_size,
                                  compute_dtype=compute_dtype,
                                  min_grid_steps=min_grid_steps)
        out = jax.block_until_ready(out)
        ref = _reference(x, params, spe_size=spe_size, patch_size=patch_size)
        assert out.shape == (B, channel // spe_size, D_model), out.shape
        out32 = out.astype(jnp.float32)
        err = float(jnp.max(jnp.abs(out32 - ref)))
        assert jnp.allclose(out32, ref, atol=atol, rtol=rtol), err

    # Small module-consistent config (B=2, C=16, P=16, spe=2, D_model=32): grid=(1,)
    run_case(0, B=2, channel=16, spe_size=2, patch_size=16, D_model=32)
    # Multi-step grid (v7x-style megacore split) + positional tiling across blocks
    run_case(1, B=4, channel=64, spe_size=2, patch_size=16, D_model=32,
             min_grid_steps=2)
    # bf16 activation/weight stream (v6e/v7x HBM lever); f32 accumulate in-kernel,
    # tolerance tracks the dtype as flagged in the review.
    run_case(2, B=4, channel=64, spe_size=2, patch_size=16, D_model=32,
             compute_dtype=jnp.bfloat16, atol=5e-2, rtol=5e-2)

    print("KERNEL_OK")
</pallas_src>

<mosaic_0001>
module attributes {stable_mosaic.version = 11 : i64} {
  func.func @_spe_patchfy_kernel(%arg0: i32, %arg1: memref<4x72xf32, #tpu.memory_space<vmem>>, %arg2: memref<72x128xf32, #tpu.memory_space<vmem>>, %arg3: memref<4x128xf32, #tpu.memory_space<vmem>>, %arg4: memref<4x128xf32, #tpu.memory_space<vmem>>) attributes {dimension_semantics = [#tpu.dimension_semantics<parallel>], iteration_bounds = array<i64: 1>, scalar_prefetch = 0 : i64, scratch_operands = 0 : i64, tpu.core_type = #tpu.core_type<tc>, window_params = [{transform_indices = @transform_0, window_bounds = array<i64: 4, 72>}, {pipeline_mode = #tpu.pipeline_mode<synchronous>, transform_indices = @transform_1, window_bounds = array<i64: 72, 128>}, {pipeline_mode = #tpu.pipeline_mode<synchronous>, transform_indices = @transform_2, window_bounds = array<i64: 4, 128>}, {transform_indices = @transform_3, window_bounds = array<i64: 4, 128>}]} {
    %c0 = arith.constant 0 : index
    %c0_0 = arith.constant 0 : index
    %0 = vector.load %arg1[%c0, %c0_0] : memref<4x72xf32, #tpu.memory_space<vmem>>, vector<4x72xf32>
    %c0_1 = arith.constant 0 : index
    %c0_2 = arith.constant 0 : index
    %1 = vector.load %arg2[%c0_1, %c0_2] : memref<72x128xf32, #tpu.memory_space<vmem>>, vector<72x128xf32>
    %cst = arith.constant dense<0.000000e+00> : vector<4x128xf32>
    %2 = tpu.matmul %0, %1, %cst {dimension_numbers = #tpu.dot_dimension_numbers<[1], [0], [0], [1], [0, 0, 1, 1], [], []>} : vector<4x72xf32>, vector<72x128xf32>, vector<4x128xf32> -> vector<4x128xf32>
    %c0_3 = arith.constant 0 : index
    %c0_4 = arith.constant 0 : index
    %3 = vector.load %arg3[%c0_3, %c0_4] : memref<4x128xf32, #tpu.memory_space<vmem>>, vector<4x128xf32>
    %4 = arith.addf %2, %3 : vector<4x128xf32>
    %c0_5 = arith.constant 0 : index
    %c0_6 = arith.constant 0 : index
    %5 = vector.load %arg4[%c0_5, %c0_6] : memref<4x128xf32, #tpu.memory_space<vmem>>, vector<4x128xf32>
    tpu.vector_store %arg4[%c0_5, %c0_6], %4 {strides = array<i32>} : memref<4x128xf32, #tpu.memory_space<vmem>>, vector<4x128xf32>,
    return
  }
  func.func @transform_0(%arg0: i32) -> (i32, i32) {
    %c0_i32 = arith.constant 0 : i32
    %c0_i32_0 = arith.constant 0 : i32
    return %arg0, %c0_i32 : i32, i32
  }
  func.func @transform_1(%arg0: i32) -> (i32, i32) {
    %c0_i32 = arith.constant 0 : i32
    %c0_i32_0 = arith.constant 0 : i32
    %c0_i32_1 = arith.constant 0 : i32
    return %c0_i32, %c0_i32_0 : i32, i32
  }
  func.func @transform_2(%arg0: i32) -> (i32, i32) {
    %c0_i32 = arith.constant 0 : i32
    %c0_i32_0 = arith.constant 0 : i32
    %c0_i32_1 = arith.constant 0 : i32
    return %c0_i32, %c0_i32_0 : i32, i32
  }
  func.func @transform_3(%arg0: i32) -> (i32, i32) {
    %c0_i32 = arith.constant 0 : i32
    %c0_i32_0 = arith.constant 0 : i32
    return %arg0, %c0_i32 : i32, i32
  }
}

</mosaic_0001>

<bundles_post_ra>
// kernel: tpu_custom_call.1
= control target key start
LH: loop header
LB: loop body
LE: loop exit
PB: predicated region body
PF: predicated region fallthrough
CT: control target
= control target key end

     0   :  { %8 = vsyncpa [#allocation3], 0  ;;  %s341_s0 = inlined_call_operand.hbm [shape: f32[4,72], index: 0, kind: input, shape index: {}]   ;;  %s342_s1 = inlined_call_operand.hbm [shape: f32[72,128], index: 1, kind: input, shape index: {}]   ;;  %s343_s2 = inlined_call_operand.vmem [shape: f32[4,128], index: 2, kind: input, shape index: {}]   ;;  %s344_s3 = inlined_call_operand.hbm [shape: f32[4,128], index: 3, kind: output, shape index: {}]  }
   0x1   :  { %9 = vsyncpa [#allocation6], 0 }
   0x2   :  { %10 = vsyncpa [#allocation4], 0  ;;  %s267_s12 = smov [#allocation2]   ;;  %s268_s14 = smov [#allocation5]  }
   0x3   :  { %s17_s13 = sshll.u32 %s267_s12, 4  ;;  %s26_s15 = sshll.u32 %s268_s14, 4  ;;  %s18_s13 = int_to_ptr.vmem [resolvable:$true] %s17_s13  ;;  %s295_s15 = int_to_ptr.vmem [resolvable:$true] %s26_s15 }
   0x4   :  { %s195_s18 = scalar_lea.hbm %s341_s0, 64 }
   0x5   :  { %p196_p0 = scmp.ne.s32.totalorder %s341_s0, %s195_s18  ;;  %p199_p1 = scmp.lt.u32.totalorder %s195_s18, %s341_s0 }
   0x7   :  { %p201_p2 = pnand %p199_p1, %p196_p0 }
   0x9   :  { %204 = shalt.err (!%p201_p2)
}
   0xa   :  { %s205_s23 = scalar_lea.vmem %s18_s13, 64  ;;  %p210_p4 = scmp.lt.s32.totalorder %s18_s13, %s18_s13 }
   0xb   :  { %p206_p3 = scmp.ne.s32.totalorder %s18_s13, %s205_s23  ;;  %p211_p5 = scmp.lt.s32.totalorder %s205_s23, %s205_s23 }
   0xd   :  { %p212_p6 = por %p211_p5, %p210_p4 }
   0xf   :  { %p213_p7 = pnand %p212_p6, %p206_p3 }
  0x11   :  { %216 = shalt.err (!%p213_p7)
}
  0x12   :  { %20 = dma.hbm_to_vmem [thread:$0]  %s341_s0, 64, %s18_s13, [#allocation3]  }
  0x13   :  { %s217_s28 = scalar_lea.hbm %s342_s1, 1152 }
  0x14   :  { %p218_p8 = scmp.ne.s32.totalorder %s342_s1, %s217_s28  ;;  %p221_p9 = scmp.lt.u32.totalorder %s217_s28, %s342_s1 }
  0x16   :  { %p223_p10 = pnand %p221_p9, %p218_p8 }
  0x18   :  { %226 = shalt.err (!%p223_p10)
}
  0x19   :  { %s227_s6 = scalar_lea.vmem %s295_s15, 1152  ;;  %p232_p12 = scmp.lt.s32.totalorder %s295_s15, %s295_s15 }
  0x1a   :  { %p228_p11 = scmp.ne.s32.totalorder %s295_s15, %s227_s6  ;;  %p233_p13 = scmp.lt.s32.totalorder %s227_s6, %s227_s6 }
  0x1c   :  { %p234_p0 = por %p233_p13, %p232_p12 }
  0x1e   :  { %p235_p1 = pnand %p234_p0, %p228_p11 }
  0x20   :  { %238 = shalt.err (!%p235_p1)
}
  0x21   :  { %s269_s0 = smov 128   ;;  %s270_s7 = smov 8  }
  0x22   :  { %32 = dma.hbm_to_vmem [thread:$0]  %s342_s1, 1152, %s295_s15, [#allocation6], %s269_s0, %s269_s0, %s270_s7  }
  0x23   :  { %261 = dma.done.wait [#allocation3], 64  }
  0x24   :  { %262 = vsyncadd [#allocation3], 4294967232 }
  0x25   :  { %263 = dma.done.wait [#allocation6], 1152  }
  0x26   :  { %264 = vsyncadd [#allocation6], 4294966144  ;;  %v271_v0 = vmov 0.0|0.0   ;;  %vm272_vm0 = vmmov 0   ;;  %v273_v1 = vmov 0.0   ;;  %v42_v2 = vld [vmem:[#allocation5] sm:$0xff] }
  0x27   :  { %175 = vmatprep.subr.bf16.mxu0 %v271_v0  ;;  %172 = vmatprep.mubr.msk.f32.mxu0 %vm272_vm0, %v273_v1  ;;  %v43_v3 = vld [vmem:[#allocation5 + $0x8] sm:$0xff]  ;;  %v44_v4 = vld [vmem:[#allocation5 + $0x10] sm:$0xff]  ;;  %v45_v6 = vld [vmem:[#allocation5 + $0x18] sm:$0xff]  ;;  %vm52_vm1 = vcmask 588800   ;;  %s274_s11 = smov [#allocation7]  }
  0x28   :  { %v176_v5 = vpack.c.bf16 %v43_v3, %v42_v2  ;;  %v179_v7 = vpack.c.bf16 %v45_v6, %v44_v4  ;;  %v46_v8 = vld [vmem:[#allocation5 + $0x20] sm:$0xff]  ;;  %v47_v9 = vld [vmem:[#allocation5 + $0x28] sm:$0xff]  ;;  %v48_v11 = vld [vmem:[#allocation5 + $0x30] sm:$0xff]  ;;  %s133_s12 = sshll.u32 %s274_s11, 4  ;;  %s134_s12 = int_to_ptr.vmem [resolvable:$true] %s133_s12 }
  0x29   :  { %v182_v10 = vpack.c.bf16 %v47_v9, %v46_v8  ;;  %v49_v12 = vld [vmem:[#allocation5 + $0x38] sm:$0xff]  ;;  %v50_v14 = vld [vmem:[#allocation5 + $0x40] sm:$0xff]  ;;  %s239_s13 = scalar_lea.vmem %s134_s12, 64  ;;  %p244_p3 = scmp.lt.s32.totalorder %s134_s12, %s134_s12 }
  0x2a   :  { %177 = vmatpush3.bf16.msra.mxu0 %v176_v5  ;;  %v185_v13 = vpack.c.bf16 %v49_v12, %v48_v11  ;;  %v41_v15 = vld [vmem:[#allocation2] sm:$0xf]  ;;  %p240_p2 = scmp.ne.s32.totalorder %s134_s12, %s239_s13  ;;  %p245_p4 = scmp.lt.s32.totalorder %s239_s13, %s239_s13 }
  0x2b   :  { %178 = vmatprep.subr.bf16.mxu0 %v271_v0  ;;  %v51_v16 = vld [vmem:[%s343_s2] sm:$0xf] }
  0x2c   :  { %p246_p5 = por %p245_p4, %p244_p3 }
  0x2e   :  { %180 = vmatpush3.bf16.msra.mxu0 %v179_v7  ;;  %p247_p6 = pnand %p246_p5, %p240_p2 }
  0x2f   :  { %181 = vmatprep.subr.bf16.mxu0 %v271_v0 }
  0x32   :  { %183 = vmatpush3.bf16.msra.mxu0 %v182_v10 }
  0x33   :  { %184 = vmatprep.subr.bf16.mxu0 %v271_v0 }
  0x36   :  { %186 = vmatpush3.bf16.msra.mxu0 %v185_v13 }
  0x37   :  { %170 = vmatprep.subr.mxu0 %v273_v1 }
  0x3a   :  { %171 = vmatpush3.msra.mxu0 %v50_v14 }
  0x3b   :  { %173 = vmatmul.mubr.msk.f32.vlgmr.msra.gmra.mrb[0].mxu0 %vm52_vm1, %v41_v15 }
 0x10e   :  { %v122_v17 = vpop.f32.mrb[0].mxu0 }
 0x10f   :  { %v123_v18 = vadd.f32 %v122_v17, %v51_v16  ;;  %v174_v19 = vpop.f32.mrb[1].mxu0 }
 0x111   :  { %126 = vst [vmem:[#allocation7] sm:$0xf] %v123_v18 }
 0x112   :  { %250 = shalt.err (!%p247_p6)
}
 0x113   :  { %s251_s16 = scalar_lea.hbm %s344_s3, 64 }
 0x114   :  { %p252_p7 = scmp.ne.s32.totalorder %s344_s3, %s251_s16  ;;  %p255_p8 = scmp.lt.u32.totalorder %s251_s16, %s344_s3 }
 0x116   :  { %p257_p9 = pnand %p255_p8, %p252_p7 }
 0x118   :  { %260 = shalt.err (!%p257_p9)
}
 0x119   :  { %136 = dma.vmem_to_hbm [thread:$0]  %s134_s12, 64, %s344_s3, [#allocation4]  }
 0x11a   :  { %265 = dma.done.wait [#allocation4], 64  }
 0x11b   :  { %266 = vsyncadd [#allocation4], 4294967232 }
 0x11c   :  { %140 = vsyncpa [#allocation3], 1 }
 0x11d   :  { %141 = vsyncpa [#allocation6], 1 }
 0x11e   :  { %142 = vsyncpa [#allocation4], 1 }

</bundles_post_ra>
